<compile_context>
chip_gen: v6e
topology: v6e:2x2x1
jax: 0.10.0
libtpu: 0.0.40
codegen_flags: <defaults>
</compile_context>

<pallas_src>
import functools

import jax
import jax.numpy as jnp
from jax import lax
from jax.experimental import pallas as pl
from jax.experimental.pallas import tpu as pltpu


# ---------------------------------------------------------------------------
# Helpers
# ---------------------------------------------------------------------------
_SMALL_LIMIT_BYTES = 2 * 1024 * 1024       # whole problem comfortably in VMEM
_X_RESIDENT_LIMIT_BYTES = 4 * 1024 * 1024  # x alone resident in VMEM
_X_RESIDENT_MAX_BATCH = 1024               # keeps the (B, tn) out block small


def _round_up(v, m):
    return ((v + m - 1) // m) * m


def _pad2(a, rows, cols):
    pr, pc = rows - a.shape[0], cols - a.shape[1]
    if pr == 0 and pc == 0:
        return a
    return jnp.pad(a, ((0, pr), (0, pc)))


def _cost(B, d_in, d_out):
    return pl.CostEstimate(
        flops=2 * B * d_in * d_out,
        transcendentals=0,
        bytes_accessed=4 * (B * d_in + d_out * d_in + B * d_out),
    )


# ---------------------------------------------------------------------------
# Small path: no grid, whole arrays resident in VMEM, no per-call padding.
# ---------------------------------------------------------------------------
def _linear_small_kernel(x_ref, w_ref, o_ref):
    # x: (B, d_in), w: (d_out, d_in) [PyTorch layout], o: (B, d_out)
    o_ref[...] = lax.dot_general(
        x_ref[...],
        w_ref[...],
        dimension_numbers=(((1,), (1,)), ((), ())),  # contract d_in with d_in
        preferred_element_type=jnp.float32,
    )


def _slpnet_small(x, weight):
    B, d_in = x.shape
    d_out, _ = weight.shape
    return pl.pallas_call(
        _linear_small_kernel,
        out_shape=jax.ShapeDtypeStruct((B, d_out), jnp.float32),
        in_specs=[
            pl.BlockSpec(memory_space=pltpu.MemorySpace.VMEM),
            pl.BlockSpec(memory_space=pltpu.MemorySpace.VMEM),
        ],
        out_specs=pl.BlockSpec(memory_space=pltpu.MemorySpace.VMEM),
        cost_estimate=_cost(B, d_in, d_out),
    )(x, weight)


# ---------------------------------------------------------------------------
# x-resident path: grid (N, K); x read from HBM once, W streamed once.
# Output block (B, tn) stays resident across K and is accumulated in place.
# ---------------------------------------------------------------------------
def _linear_xres_kernel(x_ref, w_ref, o_ref, *, tk):
    k = pl.program_id(1)

    @pl.when(k == 0)
    def _init():
        o_ref[...] = jnp.zeros_like(o_ref)

    start = pl.multiple_of(k * tk, tk)  # tk is a multiple of 128 -> aligned lane slice
    o_ref[...] += lax.dot_general(
        x_ref[:, pl.ds(start, tk)],
        w_ref[...],
        dimension_numbers=(((1,), (1,)), ((), ())),
        preferred_element_type=jnp.float32,
    )


def _slpnet_x_resident(x, weight, tn, tk):
    B, d_in = x.shape
    d_out, _ = weight.shape

    b_pad = _round_up(B, 8)
    tk = min(tk, _round_up(d_in, 128))
    tn = min(tn, _round_up(d_out, 128))
    n_pad = _round_up(d_out, tn)
    # Megacore (v7x): prefer >= 2 parallel N steps when d_out allows it.
    if n_pad // tn < 2 and tn > 128:
        tn = max(128, (tn // 2) // 128 * 128)
        n_pad = _round_up(d_out, tn)
    k_pad = _round_up(d_in, tk)

    x_p = _pad2(x, b_pad, k_pad)
    w_p = _pad2(weight, n_pad, k_pad)

    grid = (n_pad // tn, k_pad // tk)

    out = pl.pallas_call(
        functools.partial(_linear_xres_kernel, tk=tk),
        out_shape=jax.ShapeDtypeStruct((b_pad, n_pad), jnp.float32),
        grid_spec=pltpu.PrefetchScalarGridSpec(
            num_scalar_prefetch=0,
            grid=grid,
            in_specs=[
                # x: full-array block, constant index -> fetched once, resident.
                pl.BlockSpec((b_pad, k_pad), lambda j, k: (0, 0)),
                # W: (tn, tk) tiles in PyTorch layout, each streamed exactly once.
                pl.BlockSpec((tn, tk), lambda j, k: (j, k)),
            ],
            out_specs=pl.BlockSpec((b_pad, tn), lambda j, k: (0, j)),
        ),
        compiler_params=pltpu.CompilerParams(
            dimension_semantics=("parallel", "arbitrary"),
        ),
        cost_estimate=_cost(B, d_in, d_out),
    )(x_p, w_p)

    if b_pad != B or n_pad != d_out:
        out = out[:B, :d_out]
    return out


# ---------------------------------------------------------------------------
# General tiled path: (M, N, K) grid, accumulate directly into the f32 output
# block (resident across K), large 256/512-wide tiles to feed the 256x256 MXU
# and sit near the HBM roofline while staying well under v7x's VMEM budget.
# ---------------------------------------------------------------------------
def _linear_tiled_kernel(x_ref, w_ref, o_ref):
    @pl.when(pl.program_id(2) == 0)
    def _init():
        o_ref[...] = jnp.zeros_like(o_ref)

    o_ref[...] += lax.dot_general(
        x_ref[...],
        w_ref[...],
        dimension_numbers=(((1,), (1,)), ((), ())),
        preferred_element_type=jnp.float32,
    )


def _slpnet_tiled(x, weight, tm, tn, tk):
    B, d_in = x.shape
    d_out, _ = weight.shape

    tm = min(tm, _round_up(B, 8))
    tn = min(tn, _round_up(d_out, 128))
    tk = min(tk, _round_up(d_in, 128))

    m_pad = _round_up(B, tm)
    n_pad = _round_up(d_out, tn)
    k_pad = _round_up(d_in, tk)

    x_p = _pad2(x, m_pad, k_pad)
    w_p = _pad2(weight, n_pad, k_pad)

    grid = (m_pad // tm, n_pad // tn, k_pad // tk)

    out = pl.pallas_call(
        _linear_tiled_kernel,
        out_shape=jax.ShapeDtypeStruct((m_pad, n_pad), jnp.float32),
        grid_spec=pltpu.PrefetchScalarGridSpec(
            num_scalar_prefetch=0,
            grid=grid,
            in_specs=[
                pl.BlockSpec((tm, tk), lambda i, j, k: (i, k)),  # x tile
                pl.BlockSpec((tn, tk), lambda i, j, k: (j, k)),  # W tile (PyTorch layout)
            ],
            out_specs=pl.BlockSpec((tm, tn), lambda i, j, k: (i, j)),
        ),
        compiler_params=pltpu.CompilerParams(
            dimension_semantics=("parallel", "parallel", "arbitrary"),
        ),
        cost_estimate=_cost(B, d_in, d_out),
    )(x_p, w_p)

    if m_pad != B or n_pad != d_out:
        out = out[:B, :d_out]
    return out


# ---------------------------------------------------------------------------
# Public forward: y = x @ W.T  (matches SLPNet.forward, Linear without bias)
# ---------------------------------------------------------------------------
def slpnet_forward(x, weight, *, tm=256, tn=512, tk=512, _force=None):
    """x: (B, input_size) f32; weight: (output_size, input_size) f32."""
    B, d_in = x.shape
    d_out, d_in_w = weight.shape
    assert d_in == d_in_w, "weight/input dim mismatch"

    x_bytes = 4 * B * d_in
    total_bytes = 4 * (B * d_in + d_out * d_in + B * d_out)

    path = _force
    if path is None:
        if total_bytes <= _SMALL_LIMIT_BYTES:
            path = "small"
        elif x_bytes <= _X_RESIDENT_LIMIT_BYTES and B <= _X_RESIDENT_MAX_BATCH:
            path = "xres"
        else:
            path = "tiled"

    if path == "small":
        return _slpnet_small(x, weight)
    if path == "xres":
        return _slpnet_x_resident(x, weight, tn, tk)
    return _slpnet_tiled(x, weight, tm, tn, tk)

    # TODO(synk): optional bf16 operand cast (f32 accumulate) for a further ~2x
    # bandwidth win when the caller can tolerate reduced precision.


if __name__ == "__main__":
    key = jax.random.PRNGKey(0)
    k1, k2, k3, k4, k5, k6 = jax.random.split(key, 6)

    # --- knock73-style SLPNet usage: tiny Linear (no bias), small path ---
    input_size, output_size, batch = 32, 16, 8
    w = jax.random.normal(k1, (output_size, input_size), dtype=jnp.float32)
    x = jax.random.normal(k2, (batch, input_size), dtype=jnp.float32)
    y = jax.block_until_ready(slpnet_forward(x, w))
    assert y.shape == (batch, output_size)
    assert jnp.allclose(y, x @ w.T, atol=1e-5, rtol=1e-5)

    # --- x-resident (N, K) grid path, non-tile-divisible dims ---
    B2, di2, do2 = 96, 1024, 320
    w2 = jax.random.normal(k3, (do2, di2), dtype=jnp.float32)
    x2 = jax.random.normal(k4, (B2, di2), dtype=jnp.float32)
    y2 = jax.block_until_ready(slpnet_forward(x2, w2, _force="xres"))
    assert y2.shape == (B2, do2)
    assert jnp.allclose(y2, x2 @ w2.T, atol=1e-2, rtol=2e-3)

    # --- general (M, N, K) tiled path, exercises M padding + K accumulation ---
    B3, di3, do3 = 320, 1024, 384
    w3 = jax.random.normal(k5, (do3, di3), dtype=jnp.float32)
    x3 = jax.random.normal(k6, (B3, di3), dtype=jnp.float32)
    y3 = jax.block_until_ready(slpnet_forward(x3, w3, _force="tiled"))
    assert y3.shape == (B3, do3)
    assert jnp.allclose(y3, x3 @ w3.T, atol=1e-2, rtol=2e-3)

    print("KERNEL_OK")
</pallas_src>

<mosaic_0001>
module attributes {stable_mosaic.version = 11 : i64} {
  func.func @_linear_small_kernel(%arg0: memref<8x32xf32, #tpu.memory_space<vmem>>, %arg1: memref<16x32xf32, #tpu.memory_space<vmem>>, %arg2: memref<8x16xf32, #tpu.memory_space<vmem>>) attributes {dimension_semantics = [], scalar_prefetch = 0 : i64, scratch_operands = 0 : i64, tpu.core_type = #tpu.core_type<tc>} {
    %c0 = arith.constant 0 : index
    %c0_0 = arith.constant 0 : index
    %0 = vector.load %arg0[%c0, %c0_0] : memref<8x32xf32, #tpu.memory_space<vmem>>, vector<8x32xf32>
    %c0_1 = arith.constant 0 : index
    %c0_2 = arith.constant 0 : index
    %1 = vector.load %arg1[%c0_1, %c0_2] : memref<16x32xf32, #tpu.memory_space<vmem>>, vector<16x32xf32>
    %cst = arith.constant dense<0.000000e+00> : vector<8x16xf32>
    %2 = tpu.matmul %0, %1, %cst {dimension_numbers = #tpu.dot_dimension_numbers<[1], [1], [0], [0], [0, 0, 1, 0], [], []>} : vector<8x32xf32>, vector<16x32xf32>, vector<8x16xf32> -> vector<8x16xf32>
    %c0_3 = arith.constant 0 : index
    %c0_4 = arith.constant 0 : index
    %3 = vector.load %arg2[%c0_3, %c0_4] : memref<8x16xf32, #tpu.memory_space<vmem>>, vector<8x16xf32>
    tpu.vector_store %arg2[%c0_3, %c0_4], %2 {strides = array<i32>} : memref<8x16xf32, #tpu.memory_space<vmem>>, vector<8x16xf32>,
    return
  }
}

</mosaic_0001>

<bundles_post_ra>
// kernel: tpu_custom_call.1
= control target key start
LH: loop header
LB: loop body
LE: loop exit
PB: predicated region body
PF: predicated region fallthrough
CT: control target
= control target key end

     0   :  { %7 = vsyncpa [#allocation3], 0  ;;  %s256_s0 = inlined_call_operand.hbm [shape: f32[8,32], index: 0, kind: input, shape index: {}]   ;;  %s257_s1 = inlined_call_operand.hbm [shape: f32[16,32], index: 1, kind: input, shape index: {}]   ;;  %s258_s2 = inlined_call_operand.hbm [shape: f32[8,16], index: 2, kind: output, shape index: {}]  }
   0x1   :  { %8 = vsyncpa [#allocation6], 0 }
   0x2   :  { %9 = vsyncpa [#allocation4], 0  ;;  %s225_s9 = smov [#allocation2]   ;;  %s226_s11 = smov [#allocation5]  }
   0x3   :  { %s16_s10 = sshll.u32 %s225_s9, 4  ;;  %s25_s12 = sshll.u32 %s226_s11, 4  ;;  %s17_s10 = int_to_ptr.vmem [resolvable:$true] %s16_s10  ;;  %s26_s12 = int_to_ptr.vmem [resolvable:$true] %s25_s12 }
   0x4   :  { %s167_s13 = scalar_lea.vmem %s17_s10, 128  ;;  %p172_p1 = scmp.lt.s32.totalorder %s17_s10, %s17_s10 }
   0x5   :  { %p168_p0 = scmp.ne.s32.totalorder %s17_s10, %s167_s13  ;;  %p173_p2 = scmp.lt.s32.totalorder %s167_s13, %s167_s13 }
   0x7   :  { %p174_p3 = por %p173_p2, %p172_p1 }
   0x9   :  { %p175_p4 = pnand %p174_p3, %p168_p0 }
   0xb   :  { %178 = shalt.err (!%p175_p4)
}
   0xc   :  { %19 = dma.hbm_to_vmem [thread:$0]  %s256_s0, 128, %s17_s10, [#allocation3]  }
   0xd   :  { %s187_s16 = scalar_lea.vmem %s26_s12, 256  ;;  %p192_p6 = scmp.lt.s32.totalorder %s26_s12, %s26_s12 }
   0xe   :  { %p188_p5 = scmp.ne.s32.totalorder %s26_s12, %s187_s16  ;;  %p193_p7 = scmp.lt.s32.totalorder %s187_s16, %s187_s16 }
  0x10   :  { %p194_p8 = por %p193_p7, %p192_p6 }
  0x12   :  { %p195_p9 = pnand %p194_p8, %p188_p5 }
  0x14   :  { %198 = shalt.err (!%p195_p9)
}
  0x15   :  { %s227_s17 = smov 128   ;;  %s228_s18 = smov 8  }
  0x16   :  { %31 = dma.hbm_to_vmem [thread:$0]  %s257_s1, 256, %s26_s12, [#allocation6], %s227_s17, %s227_s17, %s228_s18  }
  0x17   :  { %219 = dma.done.wait [#allocation3], 128  }
  0x18   :  { %220 = vsyncadd [#allocation3], 4294967168 }
  0x19   :  { %221 = dma.done.wait [#allocation6], 256  }
  0x1a   :  { %222 = vsyncadd [#allocation6], 4294967040  ;;  %v229_v0 = vmov 0.0   ;;  %vm230_vm0 = vmmov 0   ;;  %vm41_vm1 = vcmask 261120   ;;  %v40_v1 = vld [vmem:[#allocation5 + $0x8] sm:$0xff] }
  0x1b   :  { %145 = vmatprep.subr.mxu0 %v229_v0  ;;  %149 = vmatprep.mubr.msk.f32.mxu0 %vm230_vm0, %v229_v0  ;;  %v39_v2 = vld [vmem:[#allocation5] sm:$0xff]  ;;  %v38_v3 = vld [vmem:[#allocation2] sm:$0xff]  ;;  %s231_s0 = smov [#allocation7]   ;;  %vm121_vm2 = vcmask 130048  }
  0x1c   :  { %146 = vmatpush3.xpose.msk.msra.mxu0 %vm41_vm1, %v40_v1  ;;  %s129_s21 = sshll.u32 %s231_s0, 4  ;;  %s130_s21 = int_to_ptr.vmem [resolvable:$true] %s129_s21 }
  0x1d   :  { %147 = vmatprep.subr.mxu0 %v229_v0  ;;  %s199_s1 = scalar_lea.vmem %s130_s21, 128  ;;  %p204_p11 = scmp.lt.s32.totalorder %s130_s21, %s130_s21 }
  0x1e   :  { %p200_p10 = scmp.ne.s32.totalorder %s130_s21, %s199_s1  ;;  %p205_p12 = scmp.lt.s32.totalorder %s199_s1, %s199_s1 }
  0x20   :  { %148 = vmatpush3.xpose.msk.msra.mxu0 %vm41_vm1, %v39_v2  ;;  %p206_p13 = por %p205_p12, %p204_p11 }
  0x22   :  { %p207_p0 = pnand %p206_p13, %p200_p10 }
  0x23   :  { %150 = vmatmul.mubr.msk.f32.vlgmr.msra.gmra.mxu0 %vm41_vm1, %v38_v3 }
  0xe3   :  { %v117_v4 = vpop.f32.mrf.mxu0 }
  0xe4   :  { %122 = vst.msk [vmem:[#allocation7] sm:$0xff] %vm121_vm2, %v117_v4 }
  0xe5   :  { %v151_v5 = vpop.f32.mrf.mxu0 }
  0xe6   :  { %210 = shalt.err (!%p207_p0)
}
  0xe7   :  { %132 = dma.vmem_to_hbm [thread:$0]  %s130_s21, 128, %s258_s2, [#allocation4]  }
  0xe8   :  { %223 = dma.done.wait [#allocation4], 128  }
  0xe9   :  { %224 = vsyncadd [#allocation4], 4294967168 }
  0xea   :  { %136 = vsyncpa [#allocation3], 1 }
  0xeb   :  { %137 = vsyncpa [#allocation6], 1 }
  0xec   :  { %138 = vsyncpa [#allocation4], 1 }

</bundles_post_ra>
